<compile_context>
chip_gen: v6e
topology: v6e:2x2x1
jax: 0.10.0
libtpu: 0.0.40
codegen_flags: <defaults>
</compile_context>

<pallas_src>
import functools

import jax
import jax.numpy as jnp
from jax.experimental import pallas as pl
from jax.experimental.pallas import tpu as pltpu


def _lgnn_core_kernel(radius,
                      A_ref, fa_ref, fb_ref, deg_ref, pm_ref, pd_ref,
                      w_prev_ref, w_deg_ref, w_rad_ref, wf0_ref, wf1_ref,
                      bias_ref, keep_ref, gamma_ref, beta_ref,
                      out_ref):
    f32 = jnp.float32
    cdt = A_ref.dtype                       # MXU operand dtype (bf16 / f32)

    A = A_ref[...]
    fa = fa_ref[...]
    fb = fb_ref[...]

    # prev projection + deg projection with the degree scale folded past the
    # projection:  (deg * fa) @ W_deg == deg * (fa @ W_deg).
    result = jnp.dot(fa, w_prev_ref[...], preferred_element_type=f32)
    result = result + deg_ref[...] * jnp.dot(fa, w_deg_ref[...],
                                             preferred_element_type=f32)

    # Radius branch, reassociated:  sum_r A^{2^r} (fa @ W_r), Horner-style.
    # Every A application is a lane-dense [N, Fpad] matmul with f32
    # accumulation; only the operand fed to the MXU is cast to `cdt`.
    # NOTE: for radius >> 3 in bf16 the per-hop requantization compounds; use
    # compute_dtype=float32 if that matters.
    acc = jnp.dot(fa, w_rad_ref[radius - 1], preferred_element_type=f32)
    for r in range(radius - 2, -1, -1):
        for _ in range(2 ** r):             # exponent gap 2^{r+1} - 2^r
            acc = jnp.dot(A, acc.astype(cdt), preferred_element_type=f32)
        acc = acc + jnp.dot(fa, w_rad_ref[r], preferred_element_type=f32)
    acc = jnp.dot(A, acc.astype(cdt), preferred_element_type=f32)
    result = result + acc

    # Fuse branch folded by associativity and accumulated directly:
    #   (pm @ fb) @ Wf0 + (pd @ fb) @ Wf1 == pm @ (fb @ Wf0) + pd @ (fb @ Wf1)
    vb0 = jnp.dot(fb, wf0_ref[...], preferred_element_type=f32).astype(cdt)
    vb1 = jnp.dot(fb, wf1_ref[...], preferred_element_type=f32).astype(cdt)
    result = result + jnp.dot(pm_ref[...], vb0, preferred_element_type=f32)
    result = result + jnp.dot(pd_ref[...], vb1, preferred_element_type=f32)

    # All branch biases were pre-summed once in prepare_lgnn_params().
    result = result + bias_ref[...]

    # Half-ReLU: keep_mask = 1 for columns < out_feats//2 (identity), 0 for
    # the ReLU half and the lane padding  ->  max(x, x*mask).
    result = jnp.maximum(result, result * keep_ref[...])

    # BatchNorm1d, training mode (biased batch variance, eps = 1e-5).
    # Single-pass sum / sum-of-squares in f32; var clamped at 0 to guard
    # against cancellation in E[x^2] - mean^2.
    inv_n = 1.0 / result.shape[0]
    s1 = jnp.sum(result, axis=0, keepdims=True)
    s2 = jnp.sum(result * result, axis=0, keepdims=True)
    mean = s1 * inv_n
    var = jnp.maximum(s2 * inv_n - mean * mean, 0.0)
    normed = (result - mean) * jax.lax.rsqrt(var + 1e-5)
    out_ref[...] = (normed * gamma_ref[...] + beta_ref[...]).astype(out_ref.dtype)


def prepare_lgnn_params(params, *, out_feats, compute_dtype=jnp.bfloat16):
    """One-time parameter rearrangement (hoisted out of the per-call path)."""
    f32 = jnp.float32
    cdt = jnp.dtype(compute_dtype)
    Fpad = ((out_feats + 127) // 128) * 128          # lane-dense feature width
    in_feats = params["w_prev"].shape[1]

    def pad_cols(x):
        return jnp.pad(x, ((0, 0), (0, Fpad - out_feats)))

    w_fuse = params["w_fuse"]                        # [out, 2*in]
    bias_total = (params["b_prev"] + params["b_deg"]
                  + sum(params["b_radius"]) + params["b_fuse"]).reshape(1, -1)

    n_half = out_feats // 2
    keep_mask = (jnp.arange(Fpad) < n_half).astype(f32).reshape(1, Fpad)

    return dict(
        w_prev=pad_cols(params["w_prev"].T).astype(cdt),           # [Fin, Fpad]
        w_deg=pad_cols(params["w_deg"].T).astype(cdt),             # [Fin, Fpad]
        w_rad=jnp.stack([pad_cols(w.T).astype(cdt)
                         for w in params["w_radius"]]),            # [R, Fin, Fpad]
        wf0=pad_cols(w_fuse[:, :in_feats].T).astype(cdt),          # [Fin, Fpad]
        wf1=pad_cols(w_fuse[:, in_feats:].T).astype(cdt),          # [Fin, Fpad]
        bias=pad_cols(bias_total.astype(f32)),                     # [1, Fpad]
        keep=keep_mask,                                            # [1, Fpad]
        gamma=pad_cols(params["bn_gamma"].reshape(1, -1).astype(f32)),
        beta=pad_cols(params["bn_beta"].reshape(1, -1).astype(f32)),
        out_feats=out_feats,
        fpad=Fpad,
        compute_dtype=cdt,
    )


def lgnn_core_forward(A, feat_a, feat_b, deg, pm, pd, prepared, *, radius,
                      out_dtype=jnp.float32):
    """Pallas-backed forward of LGNNCore.

    A:      [N, N]   dense adjacency (0/1); cache it in the compute dtype
                     across layers to avoid a per-call cast.
    feat_a: [N, Fin]
    feat_b: [M, Fin]
    deg:    [N, 1]
    pm, pd: [N, M]   the two incidence slices (pm_pd[:, :, 0/1]).
    prepared: output of prepare_lgnn_params().
    """
    N, _ = feat_a.shape
    f32 = jnp.float32
    cdt = prepared["compute_dtype"]
    Fpad = prepared["fpad"]
    out_feats = prepared["out_feats"]

    # Casts are no-ops when the caller already supplies compute-dtype arrays.
    inputs = (A.astype(cdt), feat_a.astype(cdt), feat_b.astype(cdt),
              deg.astype(f32), pm.astype(cdt), pd.astype(cdt),
              prepared["w_prev"], prepared["w_deg"], prepared["w_rad"],
              prepared["wf0"], prepared["wf1"],
              prepared["bias"], prepared["keep"],
              prepared["gamma"], prepared["beta"])

    # VMEM budget from the actual operand footprint (+ headroom for in-kernel
    # temporaries), clamped to the chip's per-core VMEM capacity
    # (64 MiB on v7x, 128 MiB on v5e/v6e).
    in_bytes = sum(int(x.size) * x.dtype.itemsize for x in inputs)
    out_bytes = N * Fpad * jnp.dtype(out_dtype).itemsize
    try:
        vmem_cap = int(pltpu.get_tpu_info().vmem_capacity_bytes)
    except Exception:
        vmem_cap = 64 << 20                 # conservative (v7x per-TC) fallback
    need = 4 * (in_bytes + out_bytes) + (8 << 20)
    vmem_limit = int(min(vmem_cap - (2 << 20), max(32 << 20, need)))

    vmem_spec = pl.BlockSpec(memory_space=pltpu.MemorySpace.VMEM)
    kernel = functools.partial(_lgnn_core_kernel, radius)

    out = pl.pallas_call(
        kernel,
        out_shape=jax.ShapeDtypeStruct((N, Fpad), out_dtype),
        in_specs=[vmem_spec] * len(inputs),
        out_specs=vmem_spec,
        compiler_params=pltpu.CompilerParams(vmem_limit_bytes=vmem_limit),
    )(*inputs)

    return out[:, :out_feats]


# ---------------------------- reference (plain JAX) --------------------------
def lgnn_core_reference(A, feat_a, feat_b, deg, pm_pd, params, *, radius, out_feats):
    prev_proj = feat_a @ params["w_prev"].T + params["b_prev"]
    deg_proj = (deg * feat_a) @ params["w_deg"].T + params["b_deg"]

    z = A @ feat_a
    z_list = [z]
    for i in range(radius - 1):
        for _ in range(2 ** i):
            z = A @ z
        z_list.append(z)
    radius_proj = sum(zk @ w.T + b for zk, w, b in
                      zip(z_list, params["w_radius"], params["b_radius"]))

    fuse_in = jnp.concatenate([pm_pd[:, :, 0] @ feat_b, pm_pd[:, :, 1] @ feat_b], axis=1)
    fuse = fuse_in @ params["w_fuse"].T + params["b_fuse"]

    result = prev_proj + deg_proj + radius_proj + fuse
    n = out_feats // 2
    result = jnp.concatenate([result[:, :n], jax.nn.relu(result[:, n:])], axis=1)

    mean = jnp.mean(result, axis=0, keepdims=True)
    var = jnp.mean((result - mean) ** 2, axis=0, keepdims=True)
    return (result - mean) / jnp.sqrt(var + 1e-5) * params["bn_gamma"] + params["bn_beta"]


if __name__ == "__main__":
    key = jax.random.PRNGKey(0)
    N, M = 64, 96            # nodes, "edge" rows of pm/pd / feat_b
    in_feats, out_feats, radius = 16, 16, 3

    keys = jax.random.split(key, 16)

    # synthetic graph: random symmetric 0/1 adjacency, no self loops
    adj = (jax.random.uniform(keys[0], (N, N)) < 0.1).astype(jnp.float32)
    A = jnp.maximum(adj, adj.T) * (1.0 - jnp.eye(N, dtype=jnp.float32))
    deg = jnp.sum(A, axis=1, keepdims=True)                      # [N, 1]

    feat_a = jax.random.normal(keys[1], (N, in_feats), jnp.float32)
    feat_b = jax.random.normal(keys[2], (M, in_feats), jnp.float32)
    pm = jax.random.normal(keys[3], (N, M), jnp.float32)
    pd = jax.random.normal(keys[11], (N, M), jnp.float32)
    pm_pd = jnp.stack([pm, pd], axis=-1)         # reference-layout [N, M, 2]

    def lin(kw, kb, out_f, in_f):
        s = 1.0 / jnp.sqrt(in_f)
        w = jax.random.uniform(kw, (out_f, in_f), jnp.float32, -s, s)
        b = jax.random.uniform(kb, (out_f,), jnp.float32, -s, s)
        return w, b

    w_prev, b_prev = lin(keys[4], keys[5], out_feats, in_feats)
    w_deg, b_deg = lin(keys[6], keys[7], out_feats, in_feats)
    rad_keys = jax.random.split(keys[8], 2 * radius)
    w_radius, b_radius = [], []
    for r in range(radius):
        w, b = lin(rad_keys[2 * r], rad_keys[2 * r + 1], out_feats, in_feats)
        w_radius.append(w)
        b_radius.append(b)
    w_fuse, b_fuse = lin(keys[9], keys[10], out_feats, in_feats * 2)

    params = dict(
        w_prev=w_prev, b_prev=b_prev,
        w_deg=w_deg, b_deg=b_deg,
        w_radius=w_radius, b_radius=b_radius,
        w_fuse=w_fuse, b_fuse=b_fuse,
        bn_gamma=jnp.ones((out_feats,), jnp.float32),
        bn_beta=jnp.zeros((out_feats,), jnp.float32),
    )

    ref = lgnn_core_reference(A, feat_a, feat_b, deg, pm_pd, params,
                              radius=radius, out_feats=out_feats)

    # f32 compute path: should track the reference tightly.
    prep_f32 = prepare_lgnn_params(params, out_feats=out_feats,
                                   compute_dtype=jnp.float32)
    out_f32 = lgnn_core_forward(A, feat_a, feat_b, deg, pm, pd, prep_f32,
                                radius=radius)
    out_f32 = jax.block_until_ready(out_f32)
    assert out_f32.shape == (N, out_feats)
    assert jnp.allclose(out_f32, ref, atol=5e-3, rtol=5e-3), \
        float(jnp.abs(out_f32 - ref).max())

    # Default bf16-operand / f32-accumulate path: looser tolerance for the
    # bf16 rounding of fa/fb/pm/pd/weights and the requantized hop accumulator.
    prep_bf16 = prepare_lgnn_params(params, out_feats=out_feats,
                                    compute_dtype=jnp.bfloat16)
    A_bf16 = A.astype(jnp.bfloat16)        # cache across layers in real use
    out_bf16 = lgnn_core_forward(A_bf16, feat_a, feat_b, deg, pm, pd, prep_bf16,
                                 radius=radius)
    out_bf16 = jax.block_until_ready(out_bf16)
    assert out_bf16.shape == (N, out_feats)
    assert jnp.allclose(out_bf16, ref, atol=8e-2, rtol=8e-2), \
        float(jnp.abs(out_bf16 - ref).max())

    print("KERNEL_OK")
</pallas_src>

<mosaic_0001>
module attributes {stable_mosaic.version = 11 : i64} {
  func.func @_lgnn_core_kernel(%arg0: memref<64x64xf32, #tpu.memory_space<vmem>>, %arg1: memref<64x16xf32, #tpu.memory_space<vmem>>, %arg2: memref<96x16xf32, #tpu.memory_space<vmem>>, %arg3: memref<64x1xf32, #tpu.memory_space<vmem>>, %arg4: memref<64x96xf32, #tpu.memory_space<vmem>>, %arg5: memref<64x96xf32, #tpu.memory_space<vmem>>, %arg6: memref<16x128xf32, #tpu.memory_space<vmem>>, %arg7: memref<16x128xf32, #tpu.memory_space<vmem>>, %arg8: memref<3x16x128xf32, #tpu.memory_space<vmem>>, %arg9: memref<16x128xf32, #tpu.memory_space<vmem>>, %arg10: memref<16x128xf32, #tpu.memory_space<vmem>>, %arg11: memref<1x128xf32, #tpu.memory_space<vmem>>, %arg12: memref<1x128xf32, #tpu.memory_space<vmem>>, %arg13: memref<1x128xf32, #tpu.memory_space<vmem>>, %arg14: memref<1x128xf32, #tpu.memory_space<vmem>>, %arg15: memref<64x128xf32, #tpu.memory_space<vmem>>) attributes {dimension_semantics = [], scalar_prefetch = 0 : i64, scratch_operands = 0 : i64, tpu.core_type = #tpu.core_type<tc>} {
    %c0 = arith.constant 0 : index
    %c0_0 = arith.constant 0 : index
    %0 = vector.load %arg0[%c0, %c0_0] : memref<64x64xf32, #tpu.memory_space<vmem>>, vector<64x64xf32>
    %c0_1 = arith.constant 0 : index
    %c0_2 = arith.constant 0 : index
    %1 = vector.load %arg1[%c0_1, %c0_2] : memref<64x16xf32, #tpu.memory_space<vmem>>, vector<64x16xf32>
    %c0_3 = arith.constant 0 : index
    %c0_4 = arith.constant 0 : index
    %2 = vector.load %arg2[%c0_3, %c0_4] : memref<96x16xf32, #tpu.memory_space<vmem>>, vector<96x16xf32>
    %c0_5 = arith.constant 0 : index
    %c0_6 = arith.constant 0 : index
    %3 = vector.load %arg6[%c0_5, %c0_6] : memref<16x128xf32, #tpu.memory_space<vmem>>, vector<16x128xf32>
    %cst = arith.constant dense<0.000000e+00> : vector<64x128xf32>
    %4 = tpu.matmul %1, %3, %cst {dimension_numbers = #tpu.dot_dimension_numbers<[1], [0], [0], [1], [0, 0, 1, 1], [], []>} : vector<64x16xf32>, vector<16x128xf32>, vector<64x128xf32> -> vector<64x128xf32>
    %c0_7 = arith.constant 0 : index
    %c0_8 = arith.constant 0 : index
    %5 = vector.load %arg3[%c0_7, %c0_8] : memref<64x1xf32, #tpu.memory_space<vmem>>, vector<64x1xf32>
    %c0_9 = arith.constant 0 : index
    %c0_10 = arith.constant 0 : index
    %6 = vector.load %arg7[%c0_9, %c0_10] : memref<16x128xf32, #tpu.memory_space<vmem>>, vector<16x128xf32>
    %cst_11 = arith.constant dense<0.000000e+00> : vector<64x128xf32>
    %7 = tpu.matmul %1, %6, %cst_11 {dimension_numbers = #tpu.dot_dimension_numbers<[1], [0], [0], [1], [0, 0, 1, 1], [], []>} : vector<64x16xf32>, vector<16x128xf32>, vector<64x128xf32> -> vector<64x128xf32>
    %8 = vector.broadcast %5 : vector<64x1xf32> to vector<64x128xf32>
    %9 = arith.mulf %8, %7 : vector<64x128xf32>
    %10 = arith.addf %4, %9 : vector<64x128xf32>
    %c2 = arith.constant 2 : index
    %c0_12 = arith.constant 0 : index
    %c0_13 = arith.constant 0 : index
    %11 = vector.load %arg8[%c2, %c0_12, %c0_13] : memref<3x16x128xf32, #tpu.memory_space<vmem>>, vector<1x16x128xf32>
    %12 = vector.shape_cast %11 : vector<1x16x128xf32> to vector<16x128xf32>
    %cst_14 = arith.constant dense<0.000000e+00> : vector<64x128xf32>
    %13 = tpu.matmul %1, %12, %cst_14 {dimension_numbers = #tpu.dot_dimension_numbers<[1], [0], [0], [1], [0, 0, 1, 1], [], []>} : vector<64x16xf32>, vector<16x128xf32>, vector<64x128xf32> -> vector<64x128xf32>
    %cst_15 = arith.constant dense<0.000000e+00> : vector<64x128xf32>
    %14 = tpu.matmul %0, %13, %cst_15 {dimension_numbers = #tpu.dot_dimension_numbers<[1], [0], [0], [1], [0, 0, 1, 1], [], []>} : vector<64x64xf32>, vector<64x128xf32>, vector<64x128xf32> -> vector<64x128xf32>
    %cst_16 = arith.constant dense<0.000000e+00> : vector<64x128xf32>
    %15 = tpu.matmul %0, %14, %cst_16 {dimension_numbers = #tpu.dot_dimension_numbers<[1], [0], [0], [1], [0, 0, 1, 1], [], []>} : vector<64x64xf32>, vector<64x128xf32>, vector<64x128xf32> -> vector<64x128xf32>
    %c1 = arith.constant 1 : index
    %c0_17 = arith.constant 0 : index
    %c0_18 = arith.constant 0 : index
    %16 = vector.load %arg8[%c1, %c0_17, %c0_18] : memref<3x16x128xf32, #tpu.memory_space<vmem>>, vector<1x16x128xf32>
    %17 = vector.shape_cast %16 : vector<1x16x128xf32> to vector<16x128xf32>
    %cst_19 = arith.constant dense<0.000000e+00> : vector<64x128xf32>
    %18 = tpu.matmul %1, %17, %cst_19 {dimension_numbers = #tpu.dot_dimension_numbers<[1], [0], [0], [1], [0, 0, 1, 1], [], []>} : vector<64x16xf32>, vector<16x128xf32>, vector<64x128xf32> -> vector<64x128xf32>
    %19 = arith.addf %15, %18 : vector<64x128xf32>
    %cst_20 = arith.constant dense<0.000000e+00> : vector<64x128xf32>
    %20 = tpu.matmul %0, %19, %cst_20 {dimension_numbers = #tpu.dot_dimension_numbers<[1], [0], [0], [1], [0, 0, 1, 1], [], []>} : vector<64x64xf32>, vector<64x128xf32>, vector<64x128xf32> -> vector<64x128xf32>
    %c0_21 = arith.constant 0 : index
    %c0_22 = arith.constant 0 : index
    %c0_23 = arith.constant 0 : index
    %21 = vector.load %arg8[%c0_21, %c0_22, %c0_23] : memref<3x16x128xf32, #tpu.memory_space<vmem>>, vector<1x16x128xf32>
    %22 = vector.shape_cast %21 : vector<1x16x128xf32> to vector<16x128xf32>
    %cst_24 = arith.constant dense<0.000000e+00> : vector<64x128xf32>
    %23 = tpu.matmul %1, %22, %cst_24 {dimension_numbers = #tpu.dot_dimension_numbers<[1], [0], [0], [1], [0, 0, 1, 1], [], []>} : vector<64x16xf32>, vector<16x128xf32>, vector<64x128xf32> -> vector<64x128xf32>
    %24 = arith.addf %20, %23 : vector<64x128xf32>
    %cst_25 = arith.constant dense<0.000000e+00> : vector<64x128xf32>
    %25 = tpu.matmul %0, %24, %cst_25 {dimension_numbers = #tpu.dot_dimension_numbers<[1], [0], [0], [1], [0, 0, 1, 1], [], []>} : vector<64x64xf32>, vector<64x128xf32>, vector<64x128xf32> -> vector<64x128xf32>
    %26 = arith.addf %10, %25 : vector<64x128xf32>
    %c0_26 = arith.constant 0 : index
    %c0_27 = arith.constant 0 : index
    %27 = vector.load %arg9[%c0_26, %c0_27] : memref<16x128xf32, #tpu.memory_space<vmem>>, vector<16x128xf32>
    %cst_28 = arith.constant dense<0.000000e+00> : vector<96x128xf32>
    %28 = tpu.matmul %2, %27, %cst_28 {dimension_numbers = #tpu.dot_dimension_numbers<[1], [0], [0], [1], [0, 0, 1, 1], [], []>} : vector<96x16xf32>, vector<16x128xf32>, vector<96x128xf32> -> vector<96x128xf32>
    %c0_29 = arith.constant 0 : index
    %c0_30 = arith.constant 0 : index
    %29 = vector.load %arg10[%c0_29, %c0_30] : memref<16x128xf32, #tpu.memory_space<vmem>>, vector<16x128xf32>
    %cst_31 = arith.constant dense<0.000000e+00> : vector<96x128xf32>
    %30 = tpu.matmul %2, %29, %cst_31 {dimension_numbers = #tpu.dot_dimension_numbers<[1], [0], [0], [1], [0, 0, 1, 1], [], []>} : vector<96x16xf32>, vector<16x128xf32>, vector<96x128xf32> -> vector<96x128xf32>
    %c0_32 = arith.constant 0 : index
    %c0_33 = arith.constant 0 : index
    %31 = vector.load %arg4[%c0_32, %c0_33] : memref<64x96xf32, #tpu.memory_space<vmem>>, vector<64x96xf32>
    %cst_34 = arith.constant dense<0.000000e+00> : vector<64x128xf32>
    %32 = tpu.matmul %31, %28, %cst_34 {dimension_numbers = #tpu.dot_dimension_numbers<[1], [0], [0], [1], [0, 0, 1, 1], [], []>} : vector<64x96xf32>, vector<96x128xf32>, vector<64x128xf32> -> vector<64x128xf32>
    %33 = arith.addf %26, %32 : vector<64x128xf32>
    %c0_35 = arith.constant 0 : index
    %c0_36 = arith.constant 0 : index
    %34 = vector.load %arg5[%c0_35, %c0_36] : memref<64x96xf32, #tpu.memory_space<vmem>>, vector<64x96xf32>
    %cst_37 = arith.constant dense<0.000000e+00> : vector<64x128xf32>
    %35 = tpu.matmul %34, %30, %cst_37 {dimension_numbers = #tpu.dot_dimension_numbers<[1], [0], [0], [1], [0, 0, 1, 1], [], []>} : vector<64x96xf32>, vector<96x128xf32>, vector<64x128xf32> -> vector<64x128xf32>
    %36 = arith.addf %33, %35 : vector<64x128xf32>
    %c0_38 = arith.constant 0 : index
    %c0_39 = arith.constant 0 : index
    %37 = vector.load %arg11[%c0_38, %c0_39] : memref<1x128xf32, #tpu.memory_space<vmem>>, vector<1x128xf32>
    %38 = vector.broadcast %37 : vector<1x128xf32> to vector<64x128xf32>
    %39 = arith.addf %36, %38 : vector<64x128xf32>
    %c0_40 = arith.constant 0 : index
    %c0_41 = arith.constant 0 : index
    %40 = vector.load %arg12[%c0_40, %c0_41] : memref<1x128xf32, #tpu.memory_space<vmem>>, vector<1x128xf32>
    %41 = vector.broadcast %40 : vector<1x128xf32> to vector<64x128xf32>
    %42 = arith.mulf %39, %41 : vector<64x128xf32>
    %43 = arith.maximumf %39, %42 : vector<64x128xf32>
    %cst_42 = arith.constant dense<0.000000e+00> : vector<128xf32>
    %44 = vector.multi_reduction <add>, %43, %cst_42 [0] : vector<64x128xf32> to vector<128xf32>
    %45 = vector.shape_cast %44 : vector<128xf32> to vector<1x128xf32>
    %46 = arith.mulf %43, %43 : vector<64x128xf32>
    %cst_43 = arith.constant dense<0.000000e+00> : vector<128xf32>
    %47 = vector.multi_reduction <add>, %46, %cst_43 [0] : vector<64x128xf32> to vector<128xf32>
    %48 = vector.shape_cast %47 : vector<128xf32> to vector<1x128xf32>
    %cst_44 = arith.constant 1.562500e-02 : f32
    %49 = vector.broadcast %cst_44 : f32 to vector<1x128xf32>
    %50 = arith.mulf %45, %49 : vector<1x128xf32>
    %cst_45 = arith.constant 1.562500e-02 : f32
    %51 = vector.broadcast %cst_45 : f32 to vector<1x128xf32>
    %52 = arith.mulf %48, %51 : vector<1x128xf32>
    %53 = arith.mulf %50, %50 : vector<1x128xf32>
    %54 = arith.subf %52, %53 : vector<1x128xf32>
    %cst_46 = arith.constant 0.000000e+00 : f32
    %55 = vector.broadcast %cst_46 : f32 to vector<1x128xf32>
    %56 = arith.maximumf %54, %55 : vector<1x128xf32>
    %57 = vector.broadcast %50 : vector<1x128xf32> to vector<64x128xf32>
    %58 = arith.subf %43, %57 : vector<64x128xf32>
    %cst_47 = arith.constant 9.99999974E-6 : f32
    %59 = vector.broadcast %cst_47 : f32 to vector<1x128xf32>
    %60 = arith.addf %56, %59 : vector<1x128xf32>
    %61 = math.rsqrt %60 : vector<1x128xf32>
    %62 = vector.broadcast %61 : vector<1x128xf32> to vector<64x128xf32>
    %63 = arith.mulf %58, %62 : vector<64x128xf32>
    %c0_48 = arith.constant 0 : index
    %c0_49 = arith.constant 0 : index
    %64 = vector.load %arg13[%c0_48, %c0_49] : memref<1x128xf32, #tpu.memory_space<vmem>>, vector<1x128xf32>
    %65 = vector.broadcast %64 : vector<1x128xf32> to vector<64x128xf32>
    %66 = arith.mulf %63, %65 : vector<64x128xf32>
    %c0_50 = arith.constant 0 : index
    %c0_51 = arith.constant 0 : index
    %67 = vector.load %arg14[%c0_50, %c0_51] : memref<1x128xf32, #tpu.memory_space<vmem>>, vector<1x128xf32>
    %68 = vector.broadcast %67 : vector<1x128xf32> to vector<64x128xf32>
    %69 = arith.addf %66, %68 : vector<64x128xf32>
    %c0_52 = arith.constant 0 : index
    %c0_53 = arith.constant 0 : index
    %70 = vector.load %arg15[%c0_52, %c0_53] : memref<64x128xf32, #tpu.memory_space<vmem>>, vector<64x128xf32>
    tpu.vector_store %arg15[%c0_52, %c0_53], %69 {strides = array<i32>} : memref<64x128xf32, #tpu.memory_space<vmem>>, vector<64x128xf32>,
    return
  }
}

</mosaic_0001>

<bundles_post_ra>
// kernel: tpu_custom_call.1
= control target key start
LH: loop header
LB: loop body
LE: loop exit
PB: predicated region body
PF: predicated region fallthrough
CT: control target
= control target key end

     0   :  { %20 = vsyncpa [#allocation3], 0  ;;  %s3290_s0 = inlined_call_operand.vmem [shape: f32[64,64], index: 0, kind: input, shape index: {}]   ;;  %s3291_s1 = inlined_call_operand.vmem [shape: f32[64,16], index: 1, kind: input, shape index: {}]   ;;  %s3292_s2 = inlined_call_operand.vmem [shape: f32[96,16], index: 2, kind: input, shape index: {}]   ;;  %s3293_s3 = inlined_call_operand.vmem [shape: f32[64,1], index: 3, kind: input, shape index: {}]   ;;  %s3294_s4 = inlined_call_operand.vmem [shape: f32[64,96], index: 4, kind: input, shape index: {}]   ;;  %s3295_s5 = inlined_call_operand.vmem [shape: f32[64,96], index: 5, kind: input, shape index: {}]   ;;  %s3296_s6 = inlined_call_operand.hbm [shape: f32[16,128], index: 6, kind: input, shape index: {}]   ;;  %s3297_s7 = inlined_call_operand.hbm [shape: f32[16,128], index: 7, kind: input, shape index: {}]   ;;  %s3298_s8 = inlined_call_operand.vmem [shape: f32[3,16,128], index: 8, kind: input, shape index: {}]   ;;  %s3299_s9 = inlined_call_operand.hbm [shape: f32[16,128], index: 9, kind: input, shape index: {}]   ;;  %s3300_s10 = inlined_call_operand.vmem [shape: f32[16,128], index: 10, kind: input, shape index: {}]   ;;  %s3301_s11 = inlined_call_operand.vmem [shape: f32[1,128], index: 11, kind: input, shape index: {}]   ;;  %s3302_s12 = inlined_call_operand.vmem [shape: f32[1,128], index: 12, kind: input, shape index: {}]   ;;  %s3303_s13 = inlined_call_operand.vmem [shape: f32[1,128], index: 13, kind: input, shape index: {}]   ;;  %s3304_s14 = inlined_call_operand.vmem [shape: f32[1,128], index: 14, kind: input, shape index: {}]   ;;  %s3305_s15 = inlined_call_operand.hbm [shape: f32[64,128], index: 15, kind: output, shape index: {}]  }
   0x1   :  { %21 = vsyncpa [#allocation6], 0 }
   0x2   :  { %22 = vsyncpa [#allocation4], 0  ;;  %s2634_s18 = smov [#allocation5]   ;;  %s2635_s20 = smov [#allocation2]  }
   0x3   :  { %s52_s19 = sshll.u32 %s2634_s18, 4  ;;  %s40_s21 = sshll.u32 %s2635_s20, 4  ;;  %s53_s19 = int_to_ptr.vmem [resolvable:$true] %s52_s19  ;;  %s41_s21 = int_to_ptr.vmem [resolvable:$true] %s40_s21 }
   0x4   :  { %s2556_s22 = scalar_lea.vmem %s53_s19, 256  ;;  %p2561_p1 = scmp.lt.s32.totalorder %s53_s19, %s53_s19 }
   0x5   :  { %p2557_p0 = scmp.ne.s32.totalorder %s53_s19, %s2556_s22  ;;  %p2562_p2 = scmp.lt.s32.totalorder %s2556_s22, %s2556_s22 }
   0x7   :  { %p2563_p3 = por %p2562_p2, %p2561_p1 }
   0x9   :  { %p2564_p4 = pnand %p2563_p3, %p2557_p0 }
   0xb   :  { %2567 = shalt.err (!%p2564_p4)
}
   0xc   :  { %s2636_s23 = smov 128   ;;  %s2637_s24 = smov 8  }
   0xd   :  { %58 = dma.hbm_to_vmem [thread:$0]  %s3297_s7, 256, %s53_s19, [#allocation6], %s2636_s23, %s2636_s23, %s2637_s24  }
   0xe   :  { %s2576_s27 = scalar_lea.vmem %s41_s21, 256  ;;  %p2581_p6 = scmp.lt.s32.totalorder %s41_s21, %s41_s21 }
   0xf   :  { %p2577_p5 = scmp.ne.s32.totalorder %s41_s21, %s2576_s27  ;;  %p2582_p7 = scmp.lt.s32.totalorder %s2576_s27, %s2576_s27 }
  0x11   :  { %p2583_p8 = por %p2582_p7, %p2581_p6 }
  0x13   :  { %p2584_p9 = pnand %p2583_p8, %p2577_p5 }
  0x15   :  { %2587 = shalt.err (!%p2584_p9)
}
  0x16   :  { %46 = dma.hbm_to_vmem [thread:$0]  %s3296_s6, 256, %s41_s21, [#allocation3], %s2636_s23, %s2636_s23, %s2637_s24  }
  0x17   :  { %s2638_s30 = smov [#allocation7]  }
  0x18   :  { %s66_s16 = sshll.u32 %s2638_s30, 4  ;;  %s67_s16 = int_to_ptr.vmem [resolvable:$true] %s66_s16 }
  0x19   :  { %s2596_s17 = scalar_lea.vmem %s67_s16, 256  ;;  %p2601_p11 = scmp.lt.s32.totalorder %s67_s16, %s67_s16 }
  0x1a   :  { %p2597_p10 = scmp.ne.s32.totalorder %s67_s16, %s2596_s17  ;;  %p2602_p12 = scmp.lt.s32.totalorder %s2596_s17, %s2596_s17 }
  0x1c   :  { %p2603_p13 = por %p2602_p12, %p2601_p11 }
  0x1e   :  { %p2604_p0 = pnand %p2603_p13, %p2597_p10 }
  0x20   :  { %2607 = shalt.err (!%p2604_p0)
}
  0x21   :  { %72 = dma.hbm_to_vmem [thread:$0]  %s3299_s9, 256, %s67_s16, [#allocation6], %s2636_s23, %s2636_s23, %s2637_s24  }
  0x22   :  { %2628 = dma.done.wait [#allocation3], 256  }
  0x23   :  { %2629 = vsyncadd [#allocation3], 4294967040 }
  0x24   :  { %2630 = dma.done.wait [#allocation6], 512  }
  0x25   :  { %2631 = vsyncadd [#allocation6], 4294966784  ;;  %v2639_v0 = vmov 0   ;;  %v131_v1 = vld [vmem:[#allocation5 + $0x8] sm:$0xff]  ;;  %v130_v2 = vld [vmem:[#allocation5] sm:$0xff]  ;;  %vm132_vm0 = vcmask 130048  }
  0x26   :  { %2544 = vset.pattern.permute.xlu0 %v2639_v0  ;;  %2545 = vset.pattern.permute.xlu1 %v2639_v0  ;;  %v2742_v3 = vld [vmem:[%s3291_s1] sm:$0xff]  ;;  %v2752_v5 = vld [vmem:[%s3291_s1 + $0x8] sm:$0xff]  ;;  %v2765_v8 = vld [vmem:[%s3291_s1 + $0x10] sm:$0xff]  ;;  %vm523_vm1 = vcmask 523264   ;;  %vm1489_vm2 = vcmask 785408  }
  0x27   :  { %2225 = vmatprep.subr.mxu0 %v131_v1  ;;  %2533 = vmatprep.subr.mxu1 %v131_v1  ;;  %v2747_v4 = vld [vmem:[%s3291_s1 + $0x20] sm:$0xff]  ;;  %v2757_v6 = vld [vmem:[%s3291_s1 + $0x28] sm:$0xff]  ;;  %v2774_v9 = vld [vmem:[%s3291_s1 + $0x30] sm:$0xff] }
  0x28   :  { %2226 = vmatpush3.msra.mxu0 %v131_v1  ;;  %2535 = vmatpush3.msra.mxu1 %v131_v1  ;;  %v1940_v7 = vld [vmem:[%s3298_s8 + $0x28] sm:$0xff]  ;;  %v1939_v11 = vld [vmem:[%s3298_s8 + $0x20] sm:$0xff]  ;;  %v2788_v12 = vld [vmem:[%s3291_s1 + $0x18] sm:$0xff] }
  0x29   :  { %2227 = vmatprep.subr.mxu0 %v130_v2  ;;  %2534 = vmatprep.subr.mxu1 %v130_v2  ;;  %v121_v10 = vld [vmem:[#allocation2 + $0x8] sm:$0xff]  ;;  %v2793_v13 = vld [vmem:[%s3291_s1 + $0x38] sm:$0xff]  ;;  %v120_v14 = vld [vmem:[#allocation2] sm:$0xff] }
  0x2a   :  { %2228 = vmatpush3.msra.mxu0 %v130_v2  ;;  %2536 = vmatpush3.msra.mxu1 %v130_v2  ;;  %v122_v15 = vld [vmem:[%s3293_s3] sm:$0xff]  ;;  %v124_v16 = vld [vmem:[%s3293_s3 + $0x10] sm:$0xff]  ;;  %v123_v17 = vld [vmem:[%s3293_s3 + $0x8] sm:$0xff] }
  0x2b   :  { %2229 = vmatprep.mubr.msk.f32.mxu0 %vm132_vm0, %v2742_v3  ;;  %2235 = vmatprep.mubr.msk.f32.mxu1 %vm132_vm0, %v2747_v4  ;;  %v125_v18 = vld [vmem:[%s3293_s3 + $0x18] sm:$0xff]  ;;  %v2850_v19 = vld [vmem:[%s3290_s0] sm:$0xff]  ;;  %v127_v20 = vld [vmem:[%s3293_s3 + $0x28] sm:$0xff] }
  0x2c   :  { %2230 = vmatmul.mubr.msk.f32.vlgmr.msra.gmra.mxu0 %vm132_vm0, %v2752_v5  ;;  %2236 = vmatmul.mubr.msk.f32.vlgmr.msra.gmra.mxu1 %vm132_vm0, %v2757_v6  ;;  %v126_v21 = vld [vmem:[%s3293_s3 + $0x20] sm:$0xff]  ;;  %v129_v22 = vld [vmem:[%s3293_s3 + $0x38] sm:$0xff]  ;;  %v128_v23 = vld [vmem:[%s3293_s3 + $0x30] sm:$0xff] }
  0x2d   :  { %2257 = vmatprep.subr.mxu0 %v1940_v7  ;;  %2232 = vmatprep.mubr.msk.f32.mxu0 %vm132_vm0, %v2765_v8  ;;  %v2883_v56 = vld [vmem:[%s3290_s0 + $0x8] sm:$0xff]  ;;  %v2888_v57 = vld [vmem:[%s3290_s0 + $0x10] sm:$0xff]  ;;  %v2897_v58 = vld [vmem:[%s3290_s0 + $0x18] sm:$0xff] }
  0x2e   :  { %2258 = vmatpush3.msra.mxu0 %v1940_v7  ;;  %2238 = vmatprep.mubr.msk.f32.mxu1 %vm132_vm0, %v2774_v9  ;;  %v2902_v59 = vld [vmem:[%s3290_s0 + $0x20] sm:$0xff]  ;;  %v2911_v61 = vld [vmem:[%s3290_s0 + $0x28] sm:$0xff]  ;;  %v2916_v62 = vld [vmem:[%s3290_s0 + $0x30] sm:$0xff] }
  0x2f   :  { %2241 = vmatprep.subr.mxu1 %v121_v10  ;;  %2259 = vmatprep.subr.mxu0 %v1939_v11  ;;  %v2925_v2 = vld [vmem:[%s3290_s0 + $0x38] sm:$0xff] }
  0x30   :  { %2233 = vmatmul.mubr.msk.f32.gmra.mxu0 %vm132_vm0, %v2788_v12  ;;  %2239 = vmatmul.mubr.msk.f32.gmra.mxu1 %vm132_vm0, %v2793_v13 }
  0x31   :  { %2242 = vmatpush3.msra.mxu1 %v121_v10  ;;  %2260 = vmatpush3.msra.mxu0 %v1939_v11 }
  0x32   :  { %2243 = vmatprep.subr.mxu1 %v120_v14  ;;  %2245 = vmatprep.mubr.msk.f32.mxu1 %vm132_vm0, %v2742_v3 }
  0x33   :  { %2244 = vmatpush3.msra.mxu1 %v120_v14  ;;  %2261 = vmatprep.mubr.msk.f32.mxu0 %vm132_vm0, %v2742_v3 }
  0x34   :  { %2246 = vmatmul.mubr.msk.f32.vlgmr.msra.gmra.mxu1 %vm132_vm0, %v2752_v5  ;;  %2262 = vmatmul.mubr.msk.f32.vlgmr.msra.gmra.mxu0 %vm132_vm0, %v2752_v5 }
  0x35   :  { %2248 = vmatprep.mubr.msk.f32.mxu1 %vm132_vm0, %v2765_v8  ;;  %2264 = vmatprep.mubr.msk.f32.mxu0 %vm132_vm0, %v2765_v8 }
  0x36   :  { %264 = vperm.xlu0 %2544, %v122_v15   ;;  %274 = vperm.xlu1 %2545, %v124_v16  }
  0x38   :  { %2249 = vmatmul.mubr.msk.f32.gmra.mxu1 %vm132_vm0, %v2788_v12  ;;  %2265 = vmatmul.mubr.msk.f32.gmra.mxu0 %vm132_vm0, %v2788_v12 }
  0x39   :  { %2267 = vmatprep.mubr.msk.f32.mxu0 %vm132_vm0, %v2747_v4  ;;  %2251 = vmatprep.mubr.msk.f32.mxu1 %vm132_vm0, %v2747_v4 }
  0x3a   :  { %269 = vperm.xlu0 %2544, %v123_v17   ;;  %279 = vperm.xlu1 %2545, %v125_v18  }
  0x3c   :  { %2268 = vmatmul.mubr.msk.f32.gmra.mxu0 %vm132_vm0, %v2757_v6  ;;  %2252 = vmatmul.mubr.msk.f32.gmra.mxu1 %vm132_vm0, %v2757_v6 }
  0x3d   :  { %2270 = vmatprep.mubr.msk.f32.mxu0 %vm132_vm0, %v2774_v9  ;;  %2254 = vmatprep.mubr.msk.f32.mxu1 %vm132_vm0, %v2774_v9 }
  0x3e   :  { %289 = vperm.xlu1 %2545, %v127_v20   ;;  %284 = vperm.xlu0 %2544, %v126_v21   ;;  %v1958_v20 = vld [vmem:[%s3298_s8 + $0x18] sm:$0xff]  ;;  %v1957_v21 = vld [vmem:[%s3298_s8 + $0x10] sm:$0xff] }
  0x3f   :  { %2301 = vmatprep.subr.mxu0 %v1958_v20 }
  0x40   :  { %2271 = vmatmul.mubr.msk.f32.gmra.mxu0 %vm132_vm0, %v2793_v13  ;;  %2255 = vmatmul.mubr.msk.f32.gmra.mxu1 %vm132_vm0, %v2793_v13 }
  0x41   :  { %2305 = vmatprep.mubr.msk.f32.mxu0 %vm132_vm0, %v2742_v3  ;;  %2289 = vmatprep.mubr.msk.f32.mxu1 %vm523_vm1, %v2850_v19 }
  0x42   :  { %299 = vperm.xlu1 %2545, %v129_v22   ;;  %294 = vperm.xlu0 %2544, %v128_v23  }
  0x43   :  { %2302 = vmatpush3.msra.mxu0 %v1958_v20  ;;  %v3086_v20 = vld [vmem:[%s3292_s2 + $0x50] sm:$0xff] }
  0x44   :  { %2303 = vmatprep.subr.mxu0 %v1957_v21 }
  0x45   :  { %2304 = vmatpush3.msra.mxu0 %v1957_v21  ;;  %v3095_v21 = vld [vmem:[%s3292_s2 + $0x58] sm:$0xff] }
  0x46   :  { %2306 = vmatmul.mubr.msk.f32.vlgmr.msra.gmra.mxu0 %vm132_vm0, %v2752_v5 }
  0x47   :  { %2308 = vmatprep.mubr.msk.f32.mxu0 %vm132_vm0, %v2765_v8 }
  0x4a   :  { %2309 = vmatmul.mubr.msk.f32.gmra.mxu0 %vm132_vm0, %v2788_v12 }
  0x4b   :  { %2311 = vmatprep.mubr.msk.f32.mxu0 %vm132_vm0, %v2747_v4 }
  0x4e   :  { %2312 = vmatmul.mubr.msk.f32.gmra.mxu0 %vm132_vm0, %v2757_v6 }
  0x4f   :  { %2314 = vmatprep.mubr.msk.f32.mxu0 %vm132_vm0, %v2774_v9 }
  0x52   :  { %2315 = vmatmul.mubr.msk.f32.gmra.mxu0 %vm132_vm0, %v2793_v13 }
  0x53   :  { %2349 = vmatprep.mubr.msk.f32.mxu0 %vm132_vm0, %v2742_v3  ;;  %v867_v3 = vld [vmem:[%s3298_s8 + $0x8] sm:$0xff] }
  0x54   :  { %2345 = vmatprep.subr.mxu0 %v867_v3 }
  0x55   :  { %2346 = vmatpush3.msra.mxu0 %v867_v3 }
  0xb1   :  { %v265_v24 = vpop.permute.xlu0 %264  ;;  %v275_v27 = vpop.permute.xlu1 %274 }
  0xb5   :  { %v270_v30 = vpop.permute.xlu0 %269  ;;  %v280_v36 = vpop.permute.xlu1 %279 }
  0xb9   :  { %v290_v0 = vpop.permute.xlu1 %289  ;;  %v285_v1 = vpop.permute.xlu0 %284 }
  0xbd   :  { %v300_v15 = vpop.permute.xlu1 %299 }
  0xec   :  { %v2231_v25 = vpop.f32.mrf.mxu0  ;;  %v2866_v26 = vpop.f32.mrf.mxu1 }
  0xed   :  { %v303_v35 = vmul.f32 %v2231_v25, %v270_v30  ;;  %v307_v7 = vmul.f32 %v2866_v26, %v290_v0  ;;  %v3039_v0 = vld [vmem:[%s3292_s2 + $0x18] sm:$0xff] }
  0xee   :  { %v223_v28 = vpop.f32.mrf.mxu0  ;;  %v243_v29 = vpop.f32.mrf.mxu1 }
  0xef   :  { %v302_v39 = vmul.f32 %v265_v24, %v223_v28  ;;  %v306_v10 = vmul.f32 %v285_v1, %v243_v29  ;;  %v3044_v1 = vld [vmem:[%s3292_s2 + $0x20] sm:$0xff] }
  0xf0   :  { %v2234_v31 = vpop.f32.mrf.mxu0  ;;  %v2868_v32 = vpop.f32.mrf.mxu1 }
  0xf1   :  { %v305_v43 = vmul.f32 %v2234_v31, %v280_v36  ;;  %v309_v16 = vmul.f32 %v2868_v32, %v300_v15  ;;  %v866_v31 = vld [vmem:[%s3298_s8] sm:$0xff]  ;;  %v3067_v15 = vld [vmem:[%s3292_s2 + $0x38] sm:$0xff]  ;;  %s2640_s8 = smov [#allocation8]  }
  0xf2   :  { %v233_v33 = vpop.f32.mrf.mxu0  ;;  %v2870_v34 = vpop.f32.mrf.mxu1  ;;  %2347 = vmatprep.subr.mxu0 %v866_v31  ;;  %s1910_s25 = sshll.u32 %s2640_s8, 4  ;;  %s1911_s25 = int_to_ptr.vmem [resolvable:$true] %s1910_s25 }
  0xf3   :  { %v304_v47 = vmul.f32 %v275_v27, %v233_v33  ;;  %2348 = vmatpush3.msra.mxu0 %v866_v31  ;;  %p2613_p2 = scmp.lt.s32.totalorder %s1911_s25, %s1911_s25 }
  0xf4   :  { %v2247_v37 = vpop.f32.mrf.mxu1  ;;  %v2263_v38 = vpop.f32.mrf.mxu0  ;;  %2350 = vmatmul.mubr.msk.f32.vlgmr.msra.gmra.mxu0 %vm132_vm0, %v2752_v5 }
  0xf5   :  { %v2872_v40 = vadd.f32 %v2247_v37, %v303_v35  ;;  %2352 = vmatprep.mubr.msk.f32.mxu0 %vm132_vm0, %v2765_v8 }
  0xf6   :  { %v376_v41 = vpop.f32.mrf.mxu1  ;;  %v484_v42 = vpop.f32.mrf.mxu0 }
  0xf7   :  { %v2874_v44 = vadd.f32 %v376_v41, %v302_v39 }
  0xf8   :  { %v2250_v45 = vpop.f32.mrf.mxu1  ;;  %v2266_v46 = vpop.f32.mrf.mxu0  ;;  %2353 = vmatmul.mubr.msk.f32.gmra.mxu0 %vm132_vm0, %v2788_v12 }
  0xf9   :  { %v2876_v48 = vadd.f32 %v2250_v45, %v305_v43  ;;  %2355 = vmatprep.mubr.msk.f32.mxu0 %vm132_vm0, %v2747_v4 }
  0xfa   :  { %v386_v49 = vpop.f32.mrf.mxu1  ;;  %v494_v50 = vpop.f32.mrf.mxu0 }
  0xfb   :  { %v2878_v51 = vadd.f32 %v386_v49, %v304_v47 }
  0xfc   :  { %v2269_v52 = vpop.f32.mrf.mxu0  ;;  %v2253_v60 = vpop.f32.mrf.mxu1  ;;  %2356 = vmatmul.mubr.msk.f32.gmra.mxu0 %vm132_vm0, %v2757_v6 }
  0xfd   :  { %v2928_v11 = vadd.f32 %v2253_v60, %v307_v7  ;;  %2358 = vmatprep.mubr.msk.f32.mxu0 %vm132_vm0, %v2774_v9  ;;  %v3025_v60 = vld [vmem:[%s3292_s2 + $0x8] sm:$0xff] }
  0xfe   :  { %v504_v53 = vpop.f32.mrf.mxu0  ;;  %v396_v63 = vpop.f32.mrf.mxu1  ;;  %v3053_v7 = vld [vmem:[%s3292_s2 + $0x28] sm:$0xff] }
  0xff   :  { %v2930_v14 = vadd.f32 %v396_v63, %v306_v10  ;;  %v3030_v63 = vld [vmem:[%s3292_s2 + $0x10] sm:$0xff] }
 0x100   :  { %v2272_v54 = vpop.f32.mrf.mxu0  ;;  %v2256_v17 = vpop.f32.mrf.mxu1  ;;  %2359 = vmatmul.mubr.msk.f32.gmra.mxu0 %vm132_vm0, %v2793_v13  ;;  %v3058_v10 = vld [vmem:[%s3292_s2 + $0x30] sm:$0xff] }
 0x101   :  { %2273 = vmatprep.subr.mxu1 %v2272_v54  ;;  %v2937_v18 = vadd.f32 %v2256_v17, %v309_v16  ;;  %2405 = vmatprep.mubr.msk.f32.mxu0 %vm523_vm1, %v2850_v19  ;;  %v3072_v16 = vld [vmem:[%s3292_s2 + $0x40] sm:$0xff]  ;;  %v3081_v17 = vld [vmem:[%s3292_s2 + $0x48] sm:$0xff] }
 0x102   :  { %v514_v55 = vpop.f32.mrf.mxu0  ;;  %2274 = vmatpush3.msra.mxu1 %v2272_v54  ;;  %v2961_v22 = vpop.f32.mrf.mxu1  ;;  %v1191_v54 = vld [vmem:[#allocation7] sm:$0xff] }
 0x103   :  { %2275 = vmatprep.subr.mxu1 %v514_v55 }
 0x104   :  { %2276 = vmatpush3.msra.mxu1 %v514_v55  ;;  %v3016_v55 = vld [vmem:[%s3292_s2] sm:$0xff] }
 0x105   :  { %2277 = vmatprep.subr.mxu1 %v2269_v52 }
 0x106   :  { %2278 = vmatpush3.msra.mxu1 %v2269_v52  ;;  %v2307_v5 = vpop.f32.mrf.mxu0 }
 0x107   :  { %2279 = vmatprep.subr.mxu1 %v504_v53 }
 0x108   :  { %2280 = vmatpush3.msra.mxu1 %v504_v53  ;;  %v722_v8 = vpop.f32.mrf.mxu0  ;;  %v1192_v53 = vld [vmem:[#allocation7 + $0x8] sm:$0xff] }
 0x109   :  { %2281 = vmatprep.subr.mxu1 %v2266_v46 }
 0x10a   :  { %2282 = vmatpush3.msra.mxu1 %v2266_v46  ;;  %v2310_v32 = vpop.f32.mrf.mxu0 }
 0x10b   :  { %2283 = vmatprep.subr.mxu1 %v494_v50 }
 0x10c   :  { %2284 = vmatpush3.msra.mxu1 %v494_v50  ;;  %v732_v33 = vpop.f32.mrf.mxu0 }
 0x10d   :  { %2285 = vmatprep.subr.mxu1 %v2263_v38 }
 0x10e   :  { %2286 = vmatpush3.msra.mxu1 %v2263_v38  ;;  %v2313_v36 = vpop.f32.mrf.mxu0 }
 0x10f   :  { %2287 = vmatprep.subr.mxu1 %v484_v42 }
 0x110   :  { %2288 = vmatpush3.msra.mxu1 %v484_v42  ;;  %v742_v38 = vpop.f32.mrf.mxu0 }
 0x111   :  { %2290 = vmatmul.mubr.msk.f32.vlgmr.msra.gmra.mxu1 %vm523_vm1, %v2883_v56 }
 0x112   :  { %2292 = vmatprep.mubr.msk.f32.mxu1 %vm523_vm1, %v2888_v57  ;;  %v2316_v39 = vpop.f32.mrf.mxu0 }
 0x114   :  { %v752_v43 = vpop.f32.mrf.mxu0 }
 0x115   :  { %2293 = vmatmul.mubr.msk.f32.gmra.mxu1 %vm523_vm1, %v2897_v58 }
 0x116   :  { %2295 = vmatprep.mubr.msk.f32.mxu1 %vm523_vm1, %v2902_v59 }
 0x119   :  { %2296 = vmatmul.mubr.msk.f32.gmra.mxu1 %vm523_vm1, %v2911_v61 }
 0x11a   :  { %2298 = vmatprep.mubr.msk.f32.mxu1 %vm523_vm1, %v2916_v62 }
 0x11d   :  { %2299 = vmatmul.mubr.msk.f32.gmra.mxu1 %vm523_vm1, %v2925_v2 }
 0x11e   :  { %2333 = vmatprep.mubr.msk.f32.mxu1 %vm523_vm1, %v2850_v19 }
 0x1d1   :  { %v2291_v23 = vpop.f32.mrf.mxu1 }
 0x1d3   :  { %v614_v24 = vpop.f32.mrf.mxu1 }
 0x1d5   :  { %v2294_v25 = vpop.f32.mrf.mxu1 }
 0x1d7   :  { %v624_v26 = vpop.f32.mrf.mxu1 }
 0x1d9   :  { %v2297_v27 = vpop.f32.mrf.mxu1 }
 0x1db   :  { %v634_v28 = vpop.f32.mrf.mxu1 }
 0x1dd   :  { %v2300_v29 = vpop.f32.mrf.mxu1 }
 0x1de   :  { %2317 = vmatprep.subr.mxu1 %v2300_v29 }
 0x1df   :  { %v644_v30 = vpop.f32.mrf.mxu1  ;;  %2318 = vmatpush3.msra.mxu1 %v2300_v29 }
 0x1e0   :  { %2319 = vmatprep.subr.mxu1 %v644_v30 }
 0x1e1   :  { %2320 = vmatpush3.msra.mxu1 %v644_v30 }
 0x1e2   :  { %2321 = vmatprep.subr.mxu1 %v2297_v27 }
 0x1e3   :  { %2322 = vmatpush3.msra.mxu1 %v2297_v27 }
 0x1e4   :  { %2323 = vmatprep.subr.mxu1 %v634_v28 }
 0x1e5   :  { %2324 = vmatpush3.msra.mxu1 %v634_v28 }
 0x1e6   :  { %2325 = vmatprep.subr.mxu1 %v2294_v25 }
 0x1e7   :  { %2326 = vmatpush3.msra.mxu1 %v2294_v25 }
 0x1e8   :  { %2327 = vmatprep.subr.mxu1 %v624_v26 }
 0x1e9   :  { %2328 = vmatpush3.msra.mxu1 %v624_v26 }
 0x1ea   :  { %2329 = vmatprep.subr.mxu1 %v2291_v23 }
 0x1eb   :  { %2330 = vmatpush3.msra.mxu1 %v2291_v23  ;;  %v1481_v23 = vld [vmem:[%s3294_s4] sm:$0xff] }
 0x1ec   :  { %2331 = vmatprep.subr.mxu1 %v614_v24 }
 0x1ed   :  { %2332 = vmatpush3.msra.mxu1 %v614_v24  ;;  %v2351_v24 = vpop.f32.mrf.mxu0 }
 0x1ee   :  { %2334 = vmatmul.mubr.msk.f32.vlgmr.msra.gmra.mxu1 %vm523_vm1, %v2883_v56 }
 0x1ef   :  { %2336 = vmatprep.mubr.msk.f32.mxu1 %vm523_vm1, %v2888_v57  ;;  %v934_v25 = vpop.f32.mrf.mxu0 }
 0x1f1   :  { %v2354_v26 = vpop.f32.mrf.mxu0 }
 0x1f2   :  { %2337 = vmatmul.mubr.msk.f32.gmra.mxu1 %vm523_vm1, %v2897_v58 }
 0x1f3   :  { %2339 = vmatprep.mubr.msk.f32.mxu1 %vm523_vm1, %v2902_v59  ;;  %v944_v27 = vpop.f32.mrf.mxu0 }
 0x1f5   :  { %v2357_v30 = vpop.f32.mrf.mxu0 }
 0x1f6   :  { %2340 = vmatmul.mubr.msk.f32.gmra.mxu1 %vm523_vm1, %v2911_v61 }
 0x1f7   :  { %2342 = vmatprep.mubr.msk.f32.mxu1 %vm523_vm1, %v2916_v62 }
 0x1fa   :  { %2343 = vmatmul.mubr.msk.f32.gmra.mxu1 %vm523_vm1, %v2925_v2 }
 0x1fb   :  { %2377 = vmatprep.mubr.msk.f32.mxu1 %vm523_vm1, %v2850_v19 }
 0x2ae   :  { %v2335_v12 = vpop.f32.mrf.mxu1 }
 0x2af   :  { %v833_v50 = vadd.f32 %v2335_v12, %v2307_v5  ;;  %v954_v5 = vpop.f32.mrf.mxu0 }
 0x2b0   :  { %v827_v35 = vpop.f32.mrf.mxu1 }
 0x2b1   :  { %v828_v52 = vadd.f32 %v827_v35, %v722_v8 }
 0x2b2   :  { %v2338_v4 = vpop.f32.mrf.mxu1 }
 0x2b3   :  { %v843_v47 = vadd.f32 %v2338_v4, %v2310_v32  ;;  %v2360_v32 = vpop.f32.mrf.mxu0 }
 0x2b4   :  { %v837_v37 = vpop.f32.mrf.mxu1 }
 0x2b5   :  { %v838_v49 = vadd.f32 %v837_v37, %v732_v33 }
 0x2b6   :  { %v2341_v6 = vpop.f32.mrf.mxu1 }
 0x2b7   :  { %v853_v19 = vadd.f32 %v2341_v6, %v2313_v36  ;;  %v964_v36 = vpop.f32.mrf.mxu0 }
 0x2b8   :  { %v847_v41 = vpop.f32.mrf.mxu1 }
 0x2b9   :  { %v848_v46 = vadd.f32 %v847_v41, %v742_v38 }
 0x2ba   :  { %v2344_v9 = vpop.f32.mrf.mxu1 }
 0x2bb   :  { %v863_v42 = vadd.f32 %v2344_v9, %v2316_v39 }
 0x2bc   :  { %v857_v13 = vpop.f32.mrf.mxu1 }
 0x2bd   :  { %v858_v45 = vadd.f32 %v857_v13, %v752_v43  ;;  %2361 = vmatprep.subr.mxu1 %v863_v42 }
 0x2be   :  { %2362 = vmatpush3.msra.mxu1 %v863_v42 }
 0x2bf   :  { %2363 = vmatprep.subr.mxu1 %v858_v45 }
 0x2c0   :  { %2364 = vmatpush3.msra.mxu1 %v858_v45 }
 0x2c1   :  { %2365 = vmatprep.subr.mxu1 %v853_v19 }
 0x2c2   :  { %2366 = vmatpush3.msra.mxu1 %v853_v19 }
 0x2c3   :  { %2367 = vmatprep.subr.mxu1 %v848_v46 }
 0x2c4   :  { %2368 = vmatpush3.msra.mxu1 %v848_v46 }
 0x2c5   :  { %2369 = vmatprep.subr.mxu1 %v843_v47 }
 0x2c6   :  { %2370 = vmatpush3.msra.mxu1 %v843_v47 }
 0x2c7   :  { %2371 = vmatprep.subr.mxu1 %v838_v49 }
 0x2c8   :  { %2372 = vmatpush3.msra.mxu1 %v838_v49 }
 0x2c9   :  { %2373 = vmatprep.subr.mxu1 %v833_v50 }
 0x2ca   :  { %2374 = vmatpush3.msra.mxu1 %v833_v50  ;;  %v1355_v50 = vld [vmem:[%s3300_s10 + $0x8] sm:$0xff] }
 0x2cb   :  { %2375 = vmatprep.subr.mxu1 %v828_v52 }
 0x2cc   :  { %2376 = vmatpush3.msra.mxu1 %v828_v52 }
 0x2cd   :  { %2378 = vmatmul.mubr.msk.f32.vlgmr.msra.gmra.mxu1 %vm523_vm1, %v2883_v56  ;;  %2417 = vmatprep.subr.mxu1 %v1192_v53 }
 0x2ce   :  { %2380 = vmatprep.mubr.msk.f32.mxu1 %vm523_vm1, %v2888_v57  ;;  %2418 = vmatpush3.msra.mxu1 %v1192_v53  ;;  %v1354_v53 = vld [vmem:[%s3300_s10] sm:$0xff] }
 0x2cf   :  { %2419 = vmatprep.subr.mxu1 %v1191_v54 }
 0x2d0   :  { %2420 = vmatpush3.msra.mxu1 %v1191_v54 }
 0x2d1   :  { %2381 = vmatmul.mubr.msk.f32.gmra.mxu1 %vm523_vm1, %v2897_v58 }
 0x2d2   :  { %2383 = vmatprep.mubr.msk.f32.mxu1 %vm523_vm1, %v2902_v59 }
 0x2d5   :  { %2384 = vmatmul.mubr.msk.f32.gmra.mxu1 %vm523_vm1, %v2911_v61 }
 0x2d6   :  { %2386 = vmatprep.mubr.msk.f32.mxu1 %vm523_vm1, %v2916_v62 }
 0x2d9   :  { %2387 = vmatmul.mubr.msk.f32.gmra.mxu1 %vm523_vm1, %v2925_v2 }
 0x2da   :  { %2421 = vmatprep.mubr.msk.f32.mxu1 %vm132_vm0, %v3016_v55 }
 0x2dd   :  { %2422 = vmatmul.mubr.msk.f32.vlgmr.msra.gmra.mxu1 %vm132_vm0, %v3025_v60 }
 0x2de   :  { %2424 = vmatprep.mubr.msk.f32.mxu1 %vm132_vm0, %v3030_v63 }
 0x2e1   :  { %2425 = vmatmul.mubr.msk.f32.gmra.mxu1 %vm132_vm0, %v3039_v0 }
 0x2e2   :  { %2427 = vmatprep.mubr.msk.f32.mxu1 %vm132_vm0, %v3044_v1 }
 0x2e5   :  { %2428 = vmatmul.mubr.msk.f32.gmra.mxu1 %vm132_vm0, %v3053_v7 }
 0x2e6   :  { %2430 = vmatprep.mubr.msk.f32.mxu1 %vm132_vm0, %v3058_v10 }
 0x2e9   :  { %2431 = vmatmul.mubr.msk.f32.gmra.mxu1 %vm132_vm0, %v3067_v15 }
 0x2ea   :  { %2433 = vmatprep.mubr.msk.f32.mxu1 %vm132_vm0, %v3072_v16 }
 0x2ed   :  { %2434 = vmatmul.mubr.msk.f32.gmra.mxu1 %vm132_vm0, %v3081_v17 }
 0x2ee   :  { %2436 = vmatprep.mubr.msk.f32.mxu1 %vm132_vm0, %v3086_v20 }
 0x2f1   :  { %2437 = vmatmul.mubr.msk.f32.gmra.mxu1 %vm132_vm0, %v3095_v21 }
 0x2f2   :  { %2485 = vmatprep.mubr.msk.f32.mxu1 %vm1489_vm2, %v1481_v23 }
 0x38d   :  { %v2379_v28 = vpop.f32.mrf.mxu1 }
 0x38e   :  { %v1045_v19 = vadd.f32 %v2379_v28, %v2351_v24 }
 0x38f   :  { %v1039_v29 = vpop.f32.mrf.mxu1 }
 0x390   :  { %v1040_v47 = vadd.f32 %v1039_v29, %v934_v25 }
 0x391   :  { %v2382_v3 = vpop.f32.mrf.mxu1 }
 0x392   :  { %v1055_v42 = vadd.f32 %v2382_v3, %v2354_v26 }
 0x393   :  { %v1049_v31 = vpop.f32.mrf.mxu1 }
 0x394   :  { %v1050_v13 = vadd.f32 %v1049_v31, %v944_v27 }
 0x395   :  { %v2385_v8 = vpop.f32.mrf.mxu1 }
 0x396   :  { %v1065_v6 = vadd.f32 %v2385_v8, %v2357_v30 }
 0x397   :  { %v1059_v33 = vpop.f32.mrf.mxu1 }
 0x398   :  { %v1060_v41 = vadd.f32 %v1059_v33, %v954_v5 }
 0x399   :  { %v2388_v12 = vpop.f32.mrf.mxu1 }
 0x39a   :  { %v1075_v35 = vadd.f32 %v2388_v12, %v2360_v32 }
 0x39b   :  { %v1069_v4 = vpop.f32.mrf.mxu1 }
 0x39c   :  { %v1070_v37 = vadd.f32 %v1069_v4, %v964_v36  ;;  %2389 = vmatprep.subr.mxu0 %v1075_v35  ;;  %v1630_v36 = vld [vmem:[%s3295_s5 + $0x18] sm:$0xff]  ;;  %v1631_v4 = vld [vmem:[%s3295_s5 + $0x20] sm:$0xff] }
 0x39d   :  { %2390 = vmatpush3.msra.mxu0 %v1075_v35  ;;  %v3103_v38 = vpop.f32.mrf.mxu1 }
 0x39e   :  { %2391 = vmatprep.subr.mxu0 %v1070_v37 }
 0x39f   :  { %2392 = vmatpush3.msra.mxu0 %v1070_v37  ;;  %v3105_v39 = vpop.f32.mrf.mxu1  ;;  %v1632_v37 = vld [vmem:[%s3295_s5 + $0x28] sm:$0xff] }
 0x3a0   :  { %2393 = vmatprep.subr.mxu0 %v1065_v6 }
 0x3a1   :  { %2394 = vmatpush3.msra.mxu0 %v1065_v6  ;;  %v2426_v9 = vpop.f32.mrf.mxu1  ;;  %v1634_v6 = vld [vmem:[%s3295_s5 + $0x38] sm:$0xff] }
 0x3a2   :  { %2395 = vmatprep.subr.mxu0 %v1060_v41 }
 0x3a3   :  { %2396 = vmatpush3.msra.mxu0 %v1060_v41  ;;  %v1305_v43 = vpop.f32.mrf.mxu1 }
 0x3a4   :  { %2397 = vmatprep.subr.mxu0 %v1055_v42 }
 0x3a5   :  { %2398 = vmatpush3.msra.mxu0 %v1055_v42  ;;  %v2429_v45 = vpop.f32.mrf.mxu1 }
 0x3a6   :  { %2399 = vmatprep.subr.mxu0 %v1050_v13 }
 0x3a7   :  { %2400 = vmatpush3.msra.mxu0 %v1050_v13  ;;  %v1315_v46 = vpop.f32.mrf.mxu1 }
 0x3a8   :  { %2401 = vmatprep.subr.mxu0 %v1045_v19 }
 0x3a9   :  { %2402 = vmatpush3.msra.mxu0 %v1045_v19  ;;  %v2432_v49 = vpop.f32.mrf.mxu1  ;;  %v2039_v19 = vld [vmem:[%s3301_s11] ss:$0 sm:$0xff] }
 0x3aa   :  { %2403 = vmatprep.subr.mxu0 %v1040_v47 }
 0x3ab   :  { %2404 = vmatpush3.msra.mxu0 %v1040_v47  ;;  %v1325_v52 = vpop.f32.mrf.mxu1 }
 0x3ac   :  { %2406 = vmatmul.mubr.msk.f32.vlgmr.msra.gmra.mxu0 %vm523_vm1, %v2883_v56  ;;  %2439 = vmatprep.subr.mxu0 %v1355_v50  ;;  %v1482_v56 = vld [vmem:[%s3294_s4 + $0x8] sm:$0xff] }
 0x3ad   :  { %v2435_v54 = vpop.f32.mrf.mxu1  ;;  %2440 = vmatpush3.msra.mxu0 %v1355_v50  ;;  %2408 = vmatprep.mubr.msk.f32.mxu0 %vm523_vm1, %v2888_v57  ;;  %v1483_v57 = vld [vmem:[%s3294_s4 + $0x10] sm:$0xff]  ;;  %v2040_v50 = vld [vmem:[%s3302_s12] ss:$0 sm:$0xff] }
 0x3ae   :  { %2441 = vmatprep.subr.mxu0 %v1354_v53 }
 0x3af   :  { %v1335_v23 = vpop.f32.mrf.mxu1  ;;  %2442 = vmatpush3.msra.mxu0 %v1354_v53 }
 0x3b0   :  { %2409 = vmatmul.mubr.msk.f32.gmra.mxu0 %vm523_vm1, %v2897_v58  ;;  %v1484_v58 = vld [vmem:[%s3294_s4 + $0x18] sm:$0xff] }
 0x3b1   :  { %v2438_v24 = vpop.f32.mrf.mxu1  ;;  %2411 = vmatprep.mubr.msk.f32.mxu0 %vm523_vm1, %v2902_v59  ;;  %v1485_v59 = vld [vmem:[%s3294_s4 + $0x20] sm:$0xff] }
 0x3b2   :  { %2461 = vmatprep.subr.mxu1 %v2438_v24 }
 0x3b3   :  { %v1345_v25 = vpop.f32.mrf.mxu1  ;;  %2462 = vmatpush3.msra.mxu1 %v2438_v24 }
 0x3b4   :  { %2412 = vmatmul.mubr.msk.f32.gmra.mxu0 %vm523_vm1, %v2911_v61  ;;  %2463 = vmatprep.subr.mxu1 %v1345_v25  ;;  %v1486_v61 = vld [vmem:[%s3294_s4 + $0x28] sm:$0xff] }
 0x3b5   :  { %2464 = vmatpush3.msra.mxu1 %v1345_v25  ;;  %2414 = vmatprep.mubr.msk.f32.mxu0 %vm523_vm1, %v2916_v62  ;;  %v1487_v62 = vld [vmem:[%s3294_s4 + $0x30] sm:$0xff] }
 0x3b6   :  { %2465 = vmatprep.subr.mxu1 %v2435_v54 }
 0x3b7   :  { %2466 = vmatpush3.msra.mxu1 %v2435_v54 }
 0x3b8   :  { %2415 = vmatmul.mubr.msk.f32.gmra.mxu0 %vm523_vm1, %v2925_v2  ;;  %2467 = vmatprep.subr.mxu1 %v1335_v23  ;;  %v1488_v2 = vld [vmem:[%s3294_s4 + $0x38] sm:$0xff] }
 0x3b9   :  { %2468 = vmatpush3.msra.mxu1 %v1335_v23  ;;  %2443 = vmatprep.mubr.msk.f32.mxu0 %vm132_vm0, %v3016_v55  ;;  %v1627_v55 = vld [vmem:[%s3295_s5] sm:$0xff] }
 0x3ba   :  { %2469 = vmatprep.subr.mxu1 %v2432_v49 }
 0x3bb   :  { %2470 = vmatpush3.msra.mxu1 %v2432_v49 }
 0x3bc   :  { %2444 = vmatmul.mubr.msk.f32.vlgmr.msra.gmra.mxu0 %vm132_vm0, %v3025_v60  ;;  %2471 = vmatprep.subr.mxu1 %v1325_v52 }
 0x3bd   :  { %2472 = vmatpush3.msra.mxu1 %v1325_v52  ;;  %2446 = vmatprep.mubr.msk.f32.mxu0 %vm132_vm0, %v3030_v63 }
 0x3be   :  { %2473 = vmatprep.subr.mxu1 %v2429_v45 }
 0x3bf   :  { %2474 = vmatpush3.msra.mxu1 %v2429_v45 }
 0x3c0   :  { %2447 = vmatmul.mubr.msk.f32.gmra.mxu0 %vm132_vm0, %v3039_v0  ;;  %2475 = vmatprep.subr.mxu1 %v1315_v46 }
 0x3c1   :  { %2476 = vmatpush3.msra.mxu1 %v1315_v46  ;;  %2449 = vmatprep.mubr.msk.f32.mxu0 %vm132_vm0, %v3044_v1 }
 0x3c2   :  { %2477 = vmatprep.subr.mxu1 %v2426_v9 }
 0x3c3   :  { %2478 = vmatpush3.msra.mxu1 %v2426_v9 }
 0x3c4   :  { %2450 = vmatmul.mubr.msk.f32.gmra.mxu0 %vm132_vm0, %v3053_v7  ;;  %2479 = vmatprep.subr.mxu1 %v1305_v43 }
 0x3c5   :  { %2480 = vmatpush3.msra.mxu1 %v1305_v43  ;;  %2452 = vmatprep.mubr.msk.f32.mxu0 %vm132_vm0, %v3058_v10 }
 0x3c6   :  { %2481 = vmatprep.subr.mxu1 %v3103_v38 }
 0x3c7   :  { %2482 = vmatpush3.msra.mxu1 %v3103_v38  ;;  %v1633_v38 = vld [vmem:[%s3295_s5 + $0x30] sm:$0xff] }
 0x3c8   :  { %2453 = vmatmul.mubr.msk.f32.gmra.mxu0 %vm132_vm0, %v3067_v15  ;;  %2483 = vmatprep.subr.mxu1 %v3105_v39  ;;  %v295_v15 = vpop.permute.xlu0 %294 }
 0x3c9   :  { %2484 = vmatpush3.msra.mxu1 %v3105_v39  ;;  %2455 = vmatprep.mubr.msk.f32.mxu0 %vm132_vm0, %v3072_v16 }
 0x3ca   :  { %2486 = vmatmul.mubr.msk.f32.vlgmr.msra.gmra.mxu1 %vm1489_vm2, %v1482_v56 }
 0x3cb   :  { %2488 = vmatprep.mubr.msk.f32.mxu1 %vm1489_vm2, %v1483_v57 }
 0x3cc   :  { %2456 = vmatmul.mubr.msk.f32.gmra.mxu0 %vm132_vm0, %v3081_v17 }
 0x3cd   :  { %2458 = vmatprep.mubr.msk.f32.mxu0 %vm132_vm0, %v3086_v20 }
 0x3ce   :  { %2489 = vmatmul.mubr.msk.f32.gmra.mxu1 %vm1489_vm2, %v1484_v58 }
 0x3cf   :  { %2491 = vmatprep.mubr.msk.f32.mxu1 %vm1489_vm2, %v1485_v59 }
 0x3d0   :  { %2459 = vmatmul.mubr.msk.f32.gmra.mxu0 %vm132_vm0, %v3095_v21  ;;  %v308_v21 = vmul.f32 %v295_v15, %v2870_v34 }
 0x3d1   :  { %2521 = vmatprep.mubr.msk.f32.mxu0 %vm1489_vm2, %v1627_v55 }
 0x3d2   :  { %2492 = vmatmul.mubr.msk.f32.gmra.mxu1 %vm1489_vm2, %v1486_v61  ;;  %v407_v28 = vadd.f32 %v2961_v22, %v308_v21  ;;  %v1629_v22 = vld [vmem:[%s3295_s5 + $0x10] sm:$0xff] }
 0x3d3   :  { %2494 = vmatprep.mubr.msk.f32.mxu1 %vm1489_vm2, %v1487_v62 }
 0x3d6   :  { %2495 = vmatmul.mubr.msk.f32.gmra.mxu1 %vm1489_vm2, %v1488_v2 }
 0x46c   :  { %v2407_v60 = vpop.f32.mrf.mxu0 }
 0x46d   :  { %v3188_v63 = vadd.f32 %v2407_v60, %v2872_v40 }
 0x46e   :  { %v1144_v0 = vpop.f32.mrf.mxu0 }
 0x46f   :  { %v3191_v1 = vadd.f32 %v1144_v0, %v2874_v44 }
 0x470   :  { %v2410_v7 = vpop.f32.mrf.mxu0 }
 0x471   :  { %v3194_v10 = vadd.f32 %v2410_v7, %v2876_v48 }
 0x472   :  { %v1154_v16 = vpop.f32.mrf.mxu0 }
 0x473   :  { %v3197_v17 = vadd.f32 %v1154_v16, %v2878_v51 }
 0x474   :  { %v2413_v20 = vpop.f32.mrf.mxu0 }
 0x475   :  { %v3201_v26 = vadd.f32 %v2413_v20, %v2928_v11 }
 0x476   :  { %v1164_v40 = vpop.f32.mrf.mxu0 }
 0x477   :  { %v3204_v27 = vadd.f32 %v1164_v40, %v2930_v14 }
 0x478   :  { %v2416_v44 = vpop.f32.mrf.mxu0 }
 0x479   :  { %v3208_v48 = vadd.f32 %v2416_v44, %v2937_v18  ;;  %v1628_v18 = vld [vmem:[%s3295_s5 + $0x8] sm:$0xff] }
 0x47a   :  { %v1174_v29 = vpop.f32.mrf.mxu0 }
 0x47b   :  { %v3210_v30 = vadd.f32 %v1174_v29, %v407_v28 }
 0x47c   :  { %v2445_v51 = vpop.f32.mrf.mxu0 }
 0x47e   :  { %v1422_v3 = vpop.f32.mrf.mxu0 }
 0x480   :  { %v2448_v31 = vpop.f32.mrf.mxu0 }
 0x482   :  { %v1432_v34 = vpop.f32.mrf.mxu0 }
 0x484   :  { %v2451_v5 = vpop.f32.mrf.mxu0 }
 0x486   :  { %v1442_v11 = vpop.f32.mrf.mxu0 }
 0x488   :  { %v2454_v8 = vpop.f32.mrf.mxu0 }
 0x48a   :  { %v1452_v32 = vpop.f32.mrf.mxu0  ;;  %v2487_v39 = vpop.f32.mrf.mxu1 }
 0x48b   :  { %v1620_v13 = vadd.f32 %v2487_v39, %v3188_v63 }
 0x48c   :  { %v2457_v33 = vpop.f32.mrf.mxu0  ;;  %v1580_v41 = vpop.f32.mrf.mxu1 }
 0x48d   :  { %v1619_v46 = vadd.f32 %v1580_v41, %v3191_v1 }
 0x48e   :  { %v1462_v14 = vpop.f32.mrf.mxu0  ;;  %v2490_v9 = vpop.f32.mrf.mxu1 }
 0x48f   :  { %v1622_v53 = vadd.f32 %v2490_v9, %v3194_v10 }
 0x490   :  { %v2460_v12 = vpop.f32.mrf.mxu0  ;;  %v1590_v42 = vpop.f32.mrf.mxu1 }
 0x491   :  { %2497 = vmatprep.subr.mxu0 %v2460_v12  ;;  %v1621_v25 = vadd.f32 %v1590_v42, %v3197_v17 }
 0x492   :  { %v1472_v35 = vpop.f32.mrf.mxu0  ;;  %2498 = vmatpush3.msra.mxu0 %v2460_v12  ;;  %v2493_v43 = vpop.f32.mrf.mxu1 }
 0x493   :  { %2499 = vmatprep.subr.mxu0 %v1472_v35  ;;  %v1624_v63 = vadd.f32 %v2493_v43, %v3201_v26 }
 0x494   :  { %2500 = vmatpush3.msra.mxu0 %v1472_v35  ;;  %v1600_v47 = vpop.f32.mrf.mxu1 }
 0x495   :  { %2501 = vmatprep.subr.mxu0 %v2457_v33  ;;  %v1623_v16 = vadd.f32 %v1600_v47, %v3204_v27 }
 0x496   :  { %2502 = vmatpush3.msra.mxu0 %v2457_v33  ;;  %v2496_v56 = vpop.f32.mrf.mxu1 }
 0x497   :  { %2503 = vmatprep.subr.mxu0 %v1462_v14  ;;  %v1626_v17 = vadd.f32 %v2496_v56, %v3208_v48 }
 0x498   :  { %2504 = vmatpush3.msra.mxu0 %v1462_v14  ;;  %v1610_v1 = vpop.f32.mrf.mxu1 }
 0x499   :  { %2505 = vmatprep.subr.mxu0 %v2454_v8  ;;  %v1625_v29 = vadd.f32 %v1610_v1, %v3210_v30 }
 0x49a   :  { %2506 = vmatpush3.msra.mxu0 %v2454_v8 }
 0x49b   :  { %2507 = vmatprep.subr.mxu0 %v1452_v32 }
 0x49c   :  { %2508 = vmatpush3.msra.mxu0 %v1452_v32 }
 0x49d   :  { %2509 = vmatprep.subr.mxu0 %v2451_v5 }
 0x49e   :  { %2510 = vmatpush3.msra.mxu0 %v2451_v5 }
 0x49f   :  { %2511 = vmatprep.subr.mxu0 %v1442_v11 }
 0x4a0   :  { %2512 = vmatpush3.msra.mxu0 %v1442_v11 }
 0x4a1   :  { %2513 = vmatprep.subr.mxu0 %v2448_v31 }
 0x4a2   :  { %2514 = vmatpush3.msra.mxu0 %v2448_v31 }
 0x4a3   :  { %2515 = vmatprep.subr.mxu0 %v1432_v34 }
 0x4a4   :  { %2516 = vmatpush3.msra.mxu0 %v1432_v34 }
 0x4a5   :  { %2517 = vmatprep.subr.mxu0 %v2445_v51 }
 0x4a6   :  { %2518 = vmatpush3.msra.mxu0 %v2445_v51 }
 0x4a7   :  { %2519 = vmatprep.subr.mxu0 %v1422_v3 }
 0x4a8   :  { %2520 = vmatpush3.msra.mxu0 %v1422_v3 }
 0x4a9   :  { %2522 = vmatmul.mubr.msk.f32.vlgmr.msra.gmra.mxu0 %vm1489_vm2, %v1628_v18 }
 0x4aa   :  { %2524 = vmatprep.mubr.msk.f32.mxu0 %vm1489_vm2, %v1629_v22 }
 0x4ad   :  { %2525 = vmatmul.mubr.msk.f32.gmra.mxu0 %vm1489_vm2, %v1630_v36 }
 0x4ae   :  { %2527 = vmatprep.mubr.msk.f32.mxu0 %vm1489_vm2, %v1631_v4 }
 0x4b1   :  { %2528 = vmatmul.mubr.msk.f32.gmra.mxu0 %vm1489_vm2, %v1632_v37 }
 0x4b2   :  { %2530 = vmatprep.mubr.msk.f32.mxu0 %vm1489_vm2, %v1633_v38 }
 0x4b5   :  { %2531 = vmatmul.mubr.msk.f32.gmra.mxu0 %vm1489_vm2, %v1634_v6 }
 0x569   :  { %v2523_v45 = vpop.f32.mrf.mxu0 }
 0x56a   :  { %v1765_v49 = vadd.f32 %v2523_v45, %v1620_v13 }
 0x56b   :  { %v1725_v52 = vpop.f32.mrf.mxu0 }
 0x56c   :  { %v1780_v54 = vadd.f32 %v2039_v19, %v1765_v49  ;;  %v1764_v23 = vadd.f32 %v1725_v52, %v1619_v46 }
 0x56d   :  { %v2526_v24 = vpop.f32.mrf.mxu0 }
 0x56e   :  { %v1795_v57 = vmul.f32 %v2040_v50, %v1780_v54  ;;  %v1779_v58 = vadd.f32 %v2039_v19, %v1764_v23  ;;  %v1767_v59 = vadd.f32 %v2526_v24, %v1622_v53 }
 0x56f   :  { %v1735_v61 = vpop.f32.mrf.mxu0 }
 0x570   :  { %v3250_v62 = vmax.f32 %v1780_v54, %v1795_v57  ;;  %v1794_v2 = vmul.f32 %v2040_v50, %v1779_v58  ;;  %v1782_v55 = vadd.f32 %v2039_v19, %v1767_v59  ;;  %v1766_v60 = vadd.f32 %v1735_v61, %v1621_v25 }
 0x571   :  { %v2529_v0 = vpop.f32.mrf.mxu0 }
 0x572   :  { %v3253_v7 = vmax.f32 %v1779_v58, %v1794_v2  ;;  %v1797_v10 = vmul.f32 %v2040_v50, %v1782_v55  ;;  %v1781_v15 = vadd.f32 %v2039_v19, %v1766_v60  ;;  %v1769_v20 = vadd.f32 %v2529_v0, %v1624_v63 }
 0x573   :  { %v1745_v21 = vpop.f32.mrf.mxu0  ;;  %v1824_v40 = vmul.f32 %v3250_v62, %v3250_v62 }
 0x574   :  { %v1810_v44 = vadd.f32 %v3250_v62, %v3253_v7  ;;  %v1823_v26 = vmul.f32 %v3253_v7, %v3253_v7  ;;  %v1796_v28 = vmul.f32 %v2040_v50, %v1781_v15  ;;  %v1784_v51 = vadd.f32 %v2039_v19, %v1769_v20 }
 0x575   :  { %v1768_v3 = vadd.f32 %v1745_v21, %v1623_v16  ;;  %v2532_v31 = vpop.f32.mrf.mxu0  ;;  %v3264_v34 = vmax.f32 %v1782_v55, %v1797_v10 }
 0x576   :  { %v1831_v27 = vadd.f32 %v1824_v40, %v1823_v26  ;;  %v3266_v48 = vmax.f32 %v1781_v15, %v1796_v28  ;;  %v1771_v5 = vadd.f32 %v2532_v31, %v1626_v17  ;;  %v1799_v11 = vmul.f32 %v2040_v50, %v1784_v51 }
 0x577   :  { %v1783_v8 = vadd.f32 %v2039_v19, %v1768_v3  ;;  %v1755_v32 = vpop.f32.mrf.mxu0  ;;  %v1826_v18 = vmul.f32 %v3264_v34, %v3264_v34 }
 0x578   :  { %v1811_v33 = vadd.f32 %v1810_v44, %v3266_v48  ;;  %v1825_v14 = vmul.f32 %v3266_v48, %v3266_v48  ;;  %v1786_v12 = vadd.f32 %v2039_v19, %v1771_v5  ;;  %v1770_v35 = vadd.f32 %v1755_v32, %v1625_v29 }
 0x579   :  { %v1798_v30 = vmul.f32 %v2040_v50, %v1783_v8  ;;  %v1807_v37 = vmax.f32 %v1784_v51, %v1799_v11 }
 0x57a   :  { %v1832_v22 = vadd.f32 %v1831_v27, %v1825_v14  ;;  %v1812_v36 = vadd.f32 %v1811_v33, %v3264_v34  ;;  %v1785_v4 = vadd.f32 %v2039_v19, %v1770_v35  ;;  %v1801_v6 = vmul.f32 %v2040_v50, %v1786_v12  ;;  %v2041_v27 = vld [vmem:[%s3303_s13] ss:$0 sm:$0xff]  ;;  %s2608_s13 = scalar_lea.vmem %s1911_s25, 1024 }
 0x57b   :  { %v1806_v38 = vmax.f32 %v1783_v8, %v1798_v30  ;;  %v1828_v13 = vmul.f32 %v1807_v37, %v1807_v37  ;;  %p2609_p1 = scmp.ne.s32.totalorder %s1911_s25, %s2608_s13  ;;  %p2614_p3 = scmp.lt.s32.totalorder %s2608_s13, %s2608_s13 }
 0x57c   :  { %v1833_v39 = vadd.f32 %v1832_v22, %v1826_v18  ;;  %v1800_v41 = vmul.f32 %v2040_v50, %v1785_v4  ;;  %v1809_v46 = vmax.f32 %v1786_v12, %v1801_v6 }
 0x57d   :  { %v1813_v9 = vadd.f32 %v1812_v36, %v1806_v38  ;;  %v1827_v42 = vmul.f32 %v1806_v38, %v1806_v38  ;;  %p2615_p4 = por %p2614_p3, %p2613_p2 }
 0x57e   :  { %v1808_v43 = vmax.f32 %v1785_v4, %v1800_v41  ;;  %v1830_v54 = vmul.f32 %v1809_v46, %v1809_v46 }
 0x57f   :  { %v1834_v45 = vadd.f32 %v1833_v39, %v1827_v42  ;;  %v1814_v47 = vadd.f32 %v1813_v9, %v1807_v37  ;;  %p2616_p5 = pnand %p2615_p4, %p2609_p1 }
 0x580   :  { %v1829_v49 = vmul.f32 %v1808_v43, %v1808_v43 }
 0x581   :  { %v1815_v52 = vadd.f32 %v1814_v47, %v1808_v43  ;;  %v1835_v53 = vadd.f32 %v1834_v45, %v1828_v13 }
 0x583   :  { %v1816_v23 = vadd.f32 %v1815_v52, %v1809_v46  ;;  %v1836_v24 = vadd.f32 %v1835_v53, %v1829_v49 }
 0x585   :  { %v1817_v25 = vrot.slane %v1816_v23, 4  ;;  %v1837_v19 = vadd.f32 %v1836_v24, %v1830_v54 }
 0x587   :  { %v1818_v56 = vadd.f32 %v1817_v25, %v1816_v23  ;;  %v1838_v57 = vrot.slane %v1837_v19, 4 }
 0x589   :  { %v1819_v58 = vrot.slane %v1818_v56, 2  ;;  %v1839_v59 = vadd.f32 %v1838_v57, %v1837_v19 }
 0x58b   :  { %v1820_v50 = vadd.f32 %v1819_v58, %v1818_v56  ;;  %v1840_v61 = vrot.slane %v1839_v59, 2 }
 0x58d   :  { %v1821_v2 = vrot.slane %v1820_v50, 1  ;;  %v1841_v55 = vadd.f32 %v1840_v61, %v1839_v59 }
 0x58f   :  { %v1822_v60 = vadd.f32 %v1821_v2, %v1820_v50  ;;  %v1842_v63 = vrot.slane %v1841_v55, 1 }
 0x591   :  { %v1843_v0 = vadd.f32 %v1842_v63, %v1841_v55  ;;  %v1844_v1 = vmul.f32 0.015625, %v1822_v60 }
 0x593   :  { %v1845_v10 = vmul.f32 0.015625, %v1843_v0  ;;  %v1846_v15 = vmul.f32 %v1844_v1, %v1844_v1  ;;  %v1855_v16 = vsub.f32 %v1808_v43, %v1844_v1  ;;  %v1849_v17 = vsub.f32 %v3253_v7, %v1844_v1 }
 0x594   :  { %v1850_v20 = vsub.f32 %v3250_v62, %v1844_v1  ;;  %v1851_v21 = vsub.f32 %v3266_v48, %v1844_v1  ;;  %v1852_v40 = vsub.f32 %v3264_v34, %v1844_v1  ;;  %v1853_v44 = vsub.f32 %v1806_v38, %v1844_v1  ;;  %v2042_v34 = vld [vmem:[%s3304_s14] ss:$0 sm:$0xff] }
 0x595   :  { %v1847_v26 = vsub.f32 %v1845_v10, %v1846_v15  ;;  %v1854_v28 = vsub.f32 %v1807_v37, %v1844_v1  ;;  %v1856_v29 = vsub.f32 %v1809_v46, %v1844_v1 }
 0x597   :  { %v1848_v51 = vmax.f32 %v1847_v26, 0.0 }
 0x599   :  { %v1857_v3 = vadd.f32 1e-05, %v1848_v51 }
 0x59b   :  { %2546 = vrsqrt.f32 %v1857_v3 }
 0x5a8   :  { %v2547_v31 = vpop.eup %2546 }
 0x5a9   :  { %v1865_v5 = vmul.f32 %v2547_v31, %v1855_v16  ;;  %v1859_v7 = vmul.f32 %v2547_v31, %v1849_v17  ;;  %v1860_v11 = vmul.f32 %v2547_v31, %v1850_v20  ;;  %v1861_v62 = vmul.f32 %v2547_v31, %v1851_v21 }
 0x5aa   :  { %v1862_v48 = vmul.f32 %v2547_v31, %v1852_v40  ;;  %v1863_v8 = vmul.f32 %v2547_v31, %v1853_v44  ;;  %v1864_v32 = vmul.f32 %v2547_v31, %v1854_v28  ;;  %v1866_v33 = vmul.f32 %v2547_v31, %v1856_v29 }
 0x5ab   :  { %v1880_v14 = vmul.f32 %v2041_v27, %v1865_v5  ;;  %v1874_v12 = vmul.f32 %v2041_v27, %v1859_v7  ;;  %v1875_v35 = vmul.f32 %v2041_v27, %v1860_v11  ;;  %v1876_v30 = vmul.f32 %v2041_v27, %v1861_v62 }
 0x5ac   :  { %v1877_v18 = vmul.f32 %v2041_v27, %v1862_v48  ;;  %v1878_v22 = vmul.f32 %v2041_v27, %v1863_v8  ;;  %v1879_v36 = vmul.f32 %v2041_v27, %v1864_v32  ;;  %v1881_v4 = vmul.f32 %v2041_v27, %v1866_v33 }
 0x5ad   :  { %v1895_v37 = vadd.f32 %v2042_v34, %v1880_v14  ;;  %v1889_v38 = vadd.f32 %v2042_v34, %v1874_v12  ;;  %v1890_v6 = vadd.f32 %v2042_v34, %v1875_v35  ;;  %v1891_v39 = vadd.f32 %v2042_v34, %v1876_v30 }
 0x5ae   :  { %v1892_v41 = vadd.f32 %v2042_v34, %v1877_v18  ;;  %v1893_v9 = vadd.f32 %v2042_v34, %v1878_v22  ;;  %v1894_v42 = vadd.f32 %v2042_v34, %v1879_v36  ;;  %v1896_v43 = vadd.f32 %v2042_v34, %v1881_v4 }
 0x5af   :  { %1903 = vst [vmem:[#allocation8 + $0x30] sm:$0xff] %v1895_v37  ;;  %1897 = vst [vmem:[#allocation8] sm:$0xff] %v1889_v38 }
 0x5b0   :  { %1898 = vst [vmem:[#allocation8 + $0x8] sm:$0xff] %v1890_v6  ;;  %1899 = vst [vmem:[#allocation8 + $0x10] sm:$0xff] %v1891_v39 }
 0x5b1   :  { %1900 = vst [vmem:[#allocation8 + $0x18] sm:$0xff] %v1892_v41  ;;  %1901 = vst [vmem:[#allocation8 + $0x20] sm:$0xff] %v1893_v9 }
 0x5b2   :  { %1902 = vst [vmem:[#allocation8 + $0x28] sm:$0xff] %v1894_v42  ;;  %1904 = vst [vmem:[#allocation8 + $0x38] sm:$0xff] %v1896_v43 }
 0x5b3   :  { %2619 = shalt.err (!%p2616_p5)
}
 0x5b4   :  { %1916 = dma.vmem_to_hbm [thread:$0]  %s1911_s25, 1024, %s3305_s15, [#allocation4], %s2636_s23, %s2636_s23, %s2637_s24  }
 0x5b5   :  { %2632 = dma.done.wait [#allocation4], 1024  }
 0x5b6   :  { %2633 = vsyncadd [#allocation4], 4294966272 }
 0x5b7   :  { %1920 = vsyncpa [#allocation3], 1 }
 0x5b8   :  { %1921 = vsyncpa [#allocation6], 1 }
 0x5b9   :  { %1922 = vsyncpa [#allocation4], 1 }

</bundles_post_ra>
